<compile_context>
chip_gen: v7x
topology: tpu7x:2x2x1
jax: 0.10.0
libtpu: 0.0.40
codegen_flags: <defaults>
</compile_context>

<pallas_src>
import jax
import jax.numpy as jnp
from jax import lax
from jax.experimental import pallas as pl
from jax.experimental.pallas import tpu as pltpu

# ---- problem sizes (Conv2d(3, 3, 1x1) / BatchNorm2d(3)) -------------------
N, C_IN, C_OUT, H, W = 2, 3, 3, 16, 16
HW = H * W                      # 256
BN_EPS = 1e-5

# packed-parameter offsets inside the SMEM table
OFF_W = 0                       # 9 conv weights, index c*C_IN + k
OFF_B = C_OUT * C_IN            # 3 conv biases
OFF_G = OFF_B + C_OUT           # 3 BN gammas
OFF_BE = OFF_G + C_OUT          # 3 BN betas
N_PARAMS = OFF_BE + C_OUT       # 18 floats total


def _fused_kernel(params_ref, x_ref, o_ref):
    # params_ref: SMEM (18,) f32  [w(9), b(3), gamma(3), beta(3)]
    # x_ref:      VMEM (N*C_IN,  HW) f32
    # o_ref:      VMEM (N*C_OUT, HW) f32
    inv_count = 1.0 / float(N * HW)

    # column iota (independent of everything else; used later for argmax)
    col = lax.broadcasted_iota(jnp.int32, (1, HW), 1)

    # ---- 1x1 conv via VPU broadcast FMAs (no MXU) --------------------------
    # y[n][c] = sum_k w[c,k] * x[n*C_IN + k, :] + b[c]
    y = []
    for n in range(N):
        xn = [x_ref[pl.ds(n * C_IN + k, 1), :] for k in range(C_IN)]  # (1, HW)
        yn = []
        for c in range(C_OUT):
            t = params_ref[OFF_W + c * C_IN + 0] * xn[0]
            t = t + params_ref[OFF_W + c * C_IN + 1] * xn[1]
            t = t + params_ref[OFF_W + c * C_IN + 2] * xn[2]
            t = t + params_ref[OFF_B + c]
            yn.append(t)
        y.append(yn)

    # ---- BatchNorm2d (training mode) folded into one per-channel affine ----
    z = [[None] * C_OUT for _ in range(N)]
    for c in range(C_OUT):
        s = y[0][c]
        for n in range(1, N):
            s = s + y[n][c]
        mean_c = jnp.sum(s) * inv_count
        v = jnp.float32(0.0)
        for n in range(N):
            d = y[n][c] - mean_c
            v = v + jnp.sum(d * d)
        var_c = v * inv_count
        a_c = params_ref[OFF_G + c] * lax.rsqrt(var_c + BN_EPS)
        d_c = params_ref[OFF_BE + c] - a_c * mean_c
        for n in range(N):
            # fused BN affine + ReLU
            z[n][c] = jnp.maximum(a_c * y[n][c] + d_c, 0.0)

    # ---- torch.argmax(x): flat NCHW index = row*HW + col --------------------
    maxv = jnp.max(z[0][0])
    for n in range(N):
        for c in range(C_OUT):
            if n == 0 and c == 0:
                continue
            maxv = jnp.maximum(maxv, jnp.max(z[n][c]))

    big = jnp.int32(N * C_OUT * HW)          # larger than any valid index
    arg = big
    for n in range(N):
        for c in range(C_OUT):
            flat = (n * C_OUT + c) * HW + col
            arg = jnp.minimum(arg, jnp.min(jnp.where(z[n][c] == maxv, flat, big)))
    arg_f = arg.astype(jnp.float32)

    # ---- return x * argmax(x) ------------------------------------------------
    for n in range(N):
        for c in range(C_OUT):
            o_ref[pl.ds(n * C_OUT + c, 1), :] = z[n][c] * arg_f


def non_differentiable_node_forward(x_nchw, conv_w, conv_b, bn_gamma, bn_beta):
    """x_nchw: (N, C_IN, H, W) float32 -> (N, C_OUT, H, W) float32."""
    # free, contiguous reshape (no transpose): row = n*C + c, col = h*W + w
    x2d = x_nchw.reshape(N * C_IN, HW)

    # pack all parameters into one tiny SMEM table (single DMA)
    params = jnp.concatenate(
        [conv_w.reshape(-1), conv_b.reshape(-1),
         bn_gamma.reshape(-1), bn_beta.reshape(-1)]
    ).astype(jnp.float32)

    out2d = pl.pallas_call(
        _fused_kernel,
        out_shape=jax.ShapeDtypeStruct((N * C_OUT, HW), jnp.float32),
        in_specs=[
            pl.BlockSpec(memory_space=pltpu.MemorySpace.SMEM),   # params
            pl.BlockSpec(memory_space=pltpu.MemorySpace.VMEM),   # x
        ],
        out_specs=pl.BlockSpec(memory_space=pltpu.MemorySpace.VMEM),
    )(params, x2d)

    # free, contiguous reshape back to NCHW (no transpose)
    return out2d.reshape(N, C_OUT, H, W)


if __name__ == "__main__":
    key = jax.random.PRNGKey(0)
    k_x, k_w, k_b = jax.random.split(key, 3)

    x = jax.random.normal(k_x, (N, C_IN, H, W), dtype=jnp.float32)
    conv_w = jax.random.normal(k_w, (C_OUT, C_IN, 1, 1), dtype=jnp.float32) * 0.5
    conv_b = jax.random.normal(k_b, (C_OUT,), dtype=jnp.float32) * 0.1
    bn_gamma = jnp.ones((C_OUT,), dtype=jnp.float32)   # torch BN default weight
    bn_beta = jnp.zeros((C_OUT,), dtype=jnp.float32)   # torch BN default bias

    fwd = jax.jit(non_differentiable_node_forward)
    out = fwd(x, conv_w, conv_b, bn_gamma, bn_beta)
    jax.block_until_ready(out)
    assert out.shape == (N, C_OUT, H, W) and out.dtype == jnp.float32
    print("KERNEL_OK")
</pallas_src>

<mosaic_0001>
module attributes {stable_mosaic.version = 11 : i64} {
  func.func @_fused_kernel(%arg0: memref<18xf32, #tpu.memory_space<smem>>, %arg1: memref<6x256xf32, #tpu.memory_space<vmem>>, %arg2: memref<6x256xf32, #tpu.memory_space<vmem>>) attributes {dimension_semantics = [], scalar_prefetch = 0 : i64, scratch_operands = 0 : i64, tpu.core_type = #tpu.core_type<tc>} {
    %0 = tpu.iota {dimensions = array<i32: 1>} : vector<1x256xi32>
    %c0 = arith.constant 0 : index
    %c0_0 = arith.constant 0 : index
    %1 = vector.load %arg1[%c0, %c0_0] : memref<6x256xf32, #tpu.memory_space<vmem>>, vector<1x256xf32>
    %c1 = arith.constant 1 : index
    %c0_1 = arith.constant 0 : index
    %2 = vector.load %arg1[%c1, %c0_1] : memref<6x256xf32, #tpu.memory_space<vmem>>, vector<1x256xf32>
    %c2 = arith.constant 2 : index
    %c0_2 = arith.constant 0 : index
    %3 = vector.load %arg1[%c2, %c0_2] : memref<6x256xf32, #tpu.memory_space<vmem>>, vector<1x256xf32>
    %c0_3 = arith.constant 0 : index
    %4 = memref.load %arg0[%c0_3] : memref<18xf32, #tpu.memory_space<smem>>
    %5 = vector.broadcast %4 : f32 to vector<1x256xf32>
    %6 = arith.mulf %5, %1 : vector<1x256xf32>
    %c1_4 = arith.constant 1 : index
    %7 = memref.load %arg0[%c1_4] : memref<18xf32, #tpu.memory_space<smem>>
    %8 = vector.broadcast %7 : f32 to vector<1x256xf32>
    %9 = arith.mulf %8, %2 : vector<1x256xf32>
    %10 = arith.addf %6, %9 : vector<1x256xf32>
    %c2_5 = arith.constant 2 : index
    %11 = memref.load %arg0[%c2_5] : memref<18xf32, #tpu.memory_space<smem>>
    %12 = vector.broadcast %11 : f32 to vector<1x256xf32>
    %13 = arith.mulf %12, %3 : vector<1x256xf32>
    %14 = arith.addf %10, %13 : vector<1x256xf32>
    %c9 = arith.constant 9 : index
    %15 = memref.load %arg0[%c9] : memref<18xf32, #tpu.memory_space<smem>>
    %16 = vector.broadcast %15 : f32 to vector<1x256xf32>
    %17 = arith.addf %14, %16 : vector<1x256xf32>
    %c3 = arith.constant 3 : index
    %18 = memref.load %arg0[%c3] : memref<18xf32, #tpu.memory_space<smem>>
    %19 = vector.broadcast %18 : f32 to vector<1x256xf32>
    %20 = arith.mulf %19, %1 : vector<1x256xf32>
    %c4 = arith.constant 4 : index
    %21 = memref.load %arg0[%c4] : memref<18xf32, #tpu.memory_space<smem>>
    %22 = vector.broadcast %21 : f32 to vector<1x256xf32>
    %23 = arith.mulf %22, %2 : vector<1x256xf32>
    %24 = arith.addf %20, %23 : vector<1x256xf32>
    %c5 = arith.constant 5 : index
    %25 = memref.load %arg0[%c5] : memref<18xf32, #tpu.memory_space<smem>>
    %26 = vector.broadcast %25 : f32 to vector<1x256xf32>
    %27 = arith.mulf %26, %3 : vector<1x256xf32>
    %28 = arith.addf %24, %27 : vector<1x256xf32>
    %c10 = arith.constant 10 : index
    %29 = memref.load %arg0[%c10] : memref<18xf32, #tpu.memory_space<smem>>
    %30 = vector.broadcast %29 : f32 to vector<1x256xf32>
    %31 = arith.addf %28, %30 : vector<1x256xf32>
    %c6 = arith.constant 6 : index
    %32 = memref.load %arg0[%c6] : memref<18xf32, #tpu.memory_space<smem>>
    %33 = vector.broadcast %32 : f32 to vector<1x256xf32>
    %34 = arith.mulf %33, %1 : vector<1x256xf32>
    %c7 = arith.constant 7 : index
    %35 = memref.load %arg0[%c7] : memref<18xf32, #tpu.memory_space<smem>>
    %36 = vector.broadcast %35 : f32 to vector<1x256xf32>
    %37 = arith.mulf %36, %2 : vector<1x256xf32>
    %38 = arith.addf %34, %37 : vector<1x256xf32>
    %c8 = arith.constant 8 : index
    %39 = memref.load %arg0[%c8] : memref<18xf32, #tpu.memory_space<smem>>
    %40 = vector.broadcast %39 : f32 to vector<1x256xf32>
    %41 = arith.mulf %40, %3 : vector<1x256xf32>
    %42 = arith.addf %38, %41 : vector<1x256xf32>
    %c11 = arith.constant 11 : index
    %43 = memref.load %arg0[%c11] : memref<18xf32, #tpu.memory_space<smem>>
    %44 = vector.broadcast %43 : f32 to vector<1x256xf32>
    %45 = arith.addf %42, %44 : vector<1x256xf32>
    %c3_6 = arith.constant 3 : index
    %c0_7 = arith.constant 0 : index
    %46 = vector.load %arg1[%c3_6, %c0_7] : memref<6x256xf32, #tpu.memory_space<vmem>>, vector<1x256xf32>
    %c4_8 = arith.constant 4 : index
    %c0_9 = arith.constant 0 : index
    %47 = vector.load %arg1[%c4_8, %c0_9] : memref<6x256xf32, #tpu.memory_space<vmem>>, vector<1x256xf32>
    %c5_10 = arith.constant 5 : index
    %c0_11 = arith.constant 0 : index
    %48 = vector.load %arg1[%c5_10, %c0_11] : memref<6x256xf32, #tpu.memory_space<vmem>>, vector<1x256xf32>
    %c0_12 = arith.constant 0 : index
    %49 = memref.load %arg0[%c0_12] : memref<18xf32, #tpu.memory_space<smem>>
    %50 = vector.broadcast %49 : f32 to vector<1x256xf32>
    %51 = arith.mulf %50, %46 : vector<1x256xf32>
    %c1_13 = arith.constant 1 : index
    %52 = memref.load %arg0[%c1_13] : memref<18xf32, #tpu.memory_space<smem>>
    %53 = vector.broadcast %52 : f32 to vector<1x256xf32>
    %54 = arith.mulf %53, %47 : vector<1x256xf32>
    %55 = arith.addf %51, %54 : vector<1x256xf32>
    %c2_14 = arith.constant 2 : index
    %56 = memref.load %arg0[%c2_14] : memref<18xf32, #tpu.memory_space<smem>>
    %57 = vector.broadcast %56 : f32 to vector<1x256xf32>
    %58 = arith.mulf %57, %48 : vector<1x256xf32>
    %59 = arith.addf %55, %58 : vector<1x256xf32>
    %c9_15 = arith.constant 9 : index
    %60 = memref.load %arg0[%c9_15] : memref<18xf32, #tpu.memory_space<smem>>
    %61 = vector.broadcast %60 : f32 to vector<1x256xf32>
    %62 = arith.addf %59, %61 : vector<1x256xf32>
    %c3_16 = arith.constant 3 : index
    %63 = memref.load %arg0[%c3_16] : memref<18xf32, #tpu.memory_space<smem>>
    %64 = vector.broadcast %63 : f32 to vector<1x256xf32>
    %65 = arith.mulf %64, %46 : vector<1x256xf32>
    %c4_17 = arith.constant 4 : index
    %66 = memref.load %arg0[%c4_17] : memref<18xf32, #tpu.memory_space<smem>>
    %67 = vector.broadcast %66 : f32 to vector<1x256xf32>
    %68 = arith.mulf %67, %47 : vector<1x256xf32>
    %69 = arith.addf %65, %68 : vector<1x256xf32>
    %c5_18 = arith.constant 5 : index
    %70 = memref.load %arg0[%c5_18] : memref<18xf32, #tpu.memory_space<smem>>
    %71 = vector.broadcast %70 : f32 to vector<1x256xf32>
    %72 = arith.mulf %71, %48 : vector<1x256xf32>
    %73 = arith.addf %69, %72 : vector<1x256xf32>
    %c10_19 = arith.constant 10 : index
    %74 = memref.load %arg0[%c10_19] : memref<18xf32, #tpu.memory_space<smem>>
    %75 = vector.broadcast %74 : f32 to vector<1x256xf32>
    %76 = arith.addf %73, %75 : vector<1x256xf32>
    %c6_20 = arith.constant 6 : index
    %77 = memref.load %arg0[%c6_20] : memref<18xf32, #tpu.memory_space<smem>>
    %78 = vector.broadcast %77 : f32 to vector<1x256xf32>
    %79 = arith.mulf %78, %46 : vector<1x256xf32>
    %c7_21 = arith.constant 7 : index
    %80 = memref.load %arg0[%c7_21] : memref<18xf32, #tpu.memory_space<smem>>
    %81 = vector.broadcast %80 : f32 to vector<1x256xf32>
    %82 = arith.mulf %81, %47 : vector<1x256xf32>
    %83 = arith.addf %79, %82 : vector<1x256xf32>
    %c8_22 = arith.constant 8 : index
    %84 = memref.load %arg0[%c8_22] : memref<18xf32, #tpu.memory_space<smem>>
    %85 = vector.broadcast %84 : f32 to vector<1x256xf32>
    %86 = arith.mulf %85, %48 : vector<1x256xf32>
    %87 = arith.addf %83, %86 : vector<1x256xf32>
    %c11_23 = arith.constant 11 : index
    %88 = memref.load %arg0[%c11_23] : memref<18xf32, #tpu.memory_space<smem>>
    %89 = vector.broadcast %88 : f32 to vector<1x256xf32>
    %90 = arith.addf %87, %89 : vector<1x256xf32>
    %91 = arith.addf %17, %62 : vector<1x256xf32>
    %92 = vector.shape_cast %91 : vector<1x256xf32> to vector<1x1x256xf32>
    %cst = arith.constant dense<0.000000e+00> : vector<1xf32>
    %93 = vector.multi_reduction <add>, %92, %cst [1, 2] : vector<1x1x256xf32> to vector<1xf32>
    %94 = vector.shape_cast %93 : vector<1xf32> to vector<1x1x1xf32>
    %95 = vector.extract %94[0, 0, 0] : f32 from vector<1x1x1xf32>
    %cst_24 = arith.constant 0.001953125 : f32
    %96 = arith.mulf %95, %cst_24 : f32
    %97 = vector.broadcast %96 : f32 to vector<1x256xf32>
    %98 = arith.subf %17, %97 : vector<1x256xf32>
    %99 = arith.mulf %98, %98 : vector<1x256xf32>
    %100 = vector.shape_cast %99 : vector<1x256xf32> to vector<1x1x256xf32>
    %cst_25 = arith.constant dense<0.000000e+00> : vector<1xf32>
    %101 = vector.multi_reduction <add>, %100, %cst_25 [1, 2] : vector<1x1x256xf32> to vector<1xf32>
    %102 = vector.shape_cast %101 : vector<1xf32> to vector<1x1x1xf32>
    %103 = vector.extract %102[0, 0, 0] : f32 from vector<1x1x1xf32>
    %cst_26 = arith.constant 0.000000e+00 : f32
    %104 = arith.addf %cst_26, %103 : f32
    %105 = vector.broadcast %96 : f32 to vector<1x256xf32>
    %106 = arith.subf %62, %105 : vector<1x256xf32>
    %107 = arith.mulf %106, %106 : vector<1x256xf32>
    %108 = vector.shape_cast %107 : vector<1x256xf32> to vector<1x1x256xf32>
    %cst_27 = arith.constant dense<0.000000e+00> : vector<1xf32>
    %109 = vector.multi_reduction <add>, %108, %cst_27 [1, 2] : vector<1x1x256xf32> to vector<1xf32>
    %110 = vector.shape_cast %109 : vector<1xf32> to vector<1x1x1xf32>
    %111 = vector.extract %110[0, 0, 0] : f32 from vector<1x1x1xf32>
    %112 = arith.addf %104, %111 : f32
    %cst_28 = arith.constant 0.001953125 : f32
    %113 = arith.mulf %112, %cst_28 : f32
    %c12 = arith.constant 12 : index
    %114 = memref.load %arg0[%c12] : memref<18xf32, #tpu.memory_space<smem>>
    %cst_29 = arith.constant 9.99999974E-6 : f32
    %115 = arith.addf %113, %cst_29 : f32
    %116 = math.rsqrt %115 : f32
    %117 = arith.mulf %114, %116 : f32
    %c15 = arith.constant 15 : index
    %118 = memref.load %arg0[%c15] : memref<18xf32, #tpu.memory_space<smem>>
    %119 = arith.mulf %117, %96 : f32
    %120 = arith.subf %118, %119 : f32
    %121 = vector.broadcast %117 : f32 to vector<1x256xf32>
    %122 = arith.mulf %121, %17 : vector<1x256xf32>
    %123 = vector.broadcast %120 : f32 to vector<1x256xf32>
    %124 = arith.addf %122, %123 : vector<1x256xf32>
    %cst_30 = arith.constant 0.000000e+00 : f32
    %125 = vector.broadcast %cst_30 : f32 to vector<1x256xf32>
    %126 = arith.maximumf %124, %125 : vector<1x256xf32>
    %127 = vector.broadcast %117 : f32 to vector<1x256xf32>
    %128 = arith.mulf %127, %62 : vector<1x256xf32>
    %129 = vector.broadcast %120 : f32 to vector<1x256xf32>
    %130 = arith.addf %128, %129 : vector<1x256xf32>
    %cst_31 = arith.constant 0.000000e+00 : f32
    %131 = vector.broadcast %cst_31 : f32 to vector<1x256xf32>
    %132 = arith.maximumf %130, %131 : vector<1x256xf32>
    %133 = arith.addf %31, %76 : vector<1x256xf32>
    %134 = vector.shape_cast %133 : vector<1x256xf32> to vector<1x1x256xf32>
    %cst_32 = arith.constant dense<0.000000e+00> : vector<1xf32>
    %135 = vector.multi_reduction <add>, %134, %cst_32 [1, 2] : vector<1x1x256xf32> to vector<1xf32>
    %136 = vector.shape_cast %135 : vector<1xf32> to vector<1x1x1xf32>
    %137 = vector.extract %136[0, 0, 0] : f32 from vector<1x1x1xf32>
    %cst_33 = arith.constant 0.001953125 : f32
    %138 = arith.mulf %137, %cst_33 : f32
    %139 = vector.broadcast %138 : f32 to vector<1x256xf32>
    %140 = arith.subf %31, %139 : vector<1x256xf32>
    %141 = arith.mulf %140, %140 : vector<1x256xf32>
    %142 = vector.shape_cast %141 : vector<1x256xf32> to vector<1x1x256xf32>
    %cst_34 = arith.constant dense<0.000000e+00> : vector<1xf32>
    %143 = vector.multi_reduction <add>, %142, %cst_34 [1, 2] : vector<1x1x256xf32> to vector<1xf32>
    %144 = vector.shape_cast %143 : vector<1xf32> to vector<1x1x1xf32>
    %145 = vector.extract %144[0, 0, 0] : f32 from vector<1x1x1xf32>
    %cst_35 = arith.constant 0.000000e+00 : f32
    %146 = arith.addf %cst_35, %145 : f32
    %147 = vector.broadcast %138 : f32 to vector<1x256xf32>
    %148 = arith.subf %76, %147 : vector<1x256xf32>
    %149 = arith.mulf %148, %148 : vector<1x256xf32>
    %150 = vector.shape_cast %149 : vector<1x256xf32> to vector<1x1x256xf32>
    %cst_36 = arith.constant dense<0.000000e+00> : vector<1xf32>
    %151 = vector.multi_reduction <add>, %150, %cst_36 [1, 2] : vector<1x1x256xf32> to vector<1xf32>
    %152 = vector.shape_cast %151 : vector<1xf32> to vector<1x1x1xf32>
    %153 = vector.extract %152[0, 0, 0] : f32 from vector<1x1x1xf32>
    %154 = arith.addf %146, %153 : f32
    %cst_37 = arith.constant 0.001953125 : f32
    %155 = arith.mulf %154, %cst_37 : f32
    %c13 = arith.constant 13 : index
    %156 = memref.load %arg0[%c13] : memref<18xf32, #tpu.memory_space<smem>>
    %cst_38 = arith.constant 9.99999974E-6 : f32
    %157 = arith.addf %155, %cst_38 : f32
    %158 = math.rsqrt %157 : f32
    %159 = arith.mulf %156, %158 : f32
    %c16 = arith.constant 16 : index
    %160 = memref.load %arg0[%c16] : memref<18xf32, #tpu.memory_space<smem>>
    %161 = arith.mulf %159, %138 : f32
    %162 = arith.subf %160, %161 : f32
    %163 = vector.broadcast %159 : f32 to vector<1x256xf32>
    %164 = arith.mulf %163, %31 : vector<1x256xf32>
    %165 = vector.broadcast %162 : f32 to vector<1x256xf32>
    %166 = arith.addf %164, %165 : vector<1x256xf32>
    %cst_39 = arith.constant 0.000000e+00 : f32
    %167 = vector.broadcast %cst_39 : f32 to vector<1x256xf32>
    %168 = arith.maximumf %166, %167 : vector<1x256xf32>
    %169 = vector.broadcast %159 : f32 to vector<1x256xf32>
    %170 = arith.mulf %169, %76 : vector<1x256xf32>
    %171 = vector.broadcast %162 : f32 to vector<1x256xf32>
    %172 = arith.addf %170, %171 : vector<1x256xf32>
    %cst_40 = arith.constant 0.000000e+00 : f32
    %173 = vector.broadcast %cst_40 : f32 to vector<1x256xf32>
    %174 = arith.maximumf %172, %173 : vector<1x256xf32>
    %175 = arith.addf %45, %90 : vector<1x256xf32>
    %176 = vector.shape_cast %175 : vector<1x256xf32> to vector<1x1x256xf32>
    %cst_41 = arith.constant dense<0.000000e+00> : vector<1xf32>
    %177 = vector.multi_reduction <add>, %176, %cst_41 [1, 2] : vector<1x1x256xf32> to vector<1xf32>
    %178 = vector.shape_cast %177 : vector<1xf32> to vector<1x1x1xf32>
    %179 = vector.extract %178[0, 0, 0] : f32 from vector<1x1x1xf32>
    %cst_42 = arith.constant 0.001953125 : f32
    %180 = arith.mulf %179, %cst_42 : f32
    %181 = vector.broadcast %180 : f32 to vector<1x256xf32>
    %182 = arith.subf %45, %181 : vector<1x256xf32>
    %183 = arith.mulf %182, %182 : vector<1x256xf32>
    %184 = vector.shape_cast %183 : vector<1x256xf32> to vector<1x1x256xf32>
    %cst_43 = arith.constant dense<0.000000e+00> : vector<1xf32>
    %185 = vector.multi_reduction <add>, %184, %cst_43 [1, 2] : vector<1x1x256xf32> to vector<1xf32>
    %186 = vector.shape_cast %185 : vector<1xf32> to vector<1x1x1xf32>
    %187 = vector.extract %186[0, 0, 0] : f32 from vector<1x1x1xf32>
    %cst_44 = arith.constant 0.000000e+00 : f32
    %188 = arith.addf %cst_44, %187 : f32
    %189 = vector.broadcast %180 : f32 to vector<1x256xf32>
    %190 = arith.subf %90, %189 : vector<1x256xf32>
    %191 = arith.mulf %190, %190 : vector<1x256xf32>
    %192 = vector.shape_cast %191 : vector<1x256xf32> to vector<1x1x256xf32>
    %cst_45 = arith.constant dense<0.000000e+00> : vector<1xf32>
    %193 = vector.multi_reduction <add>, %192, %cst_45 [1, 2] : vector<1x1x256xf32> to vector<1xf32>
    %194 = vector.shape_cast %193 : vector<1xf32> to vector<1x1x1xf32>
    %195 = vector.extract %194[0, 0, 0] : f32 from vector<1x1x1xf32>
    %196 = arith.addf %188, %195 : f32
    %cst_46 = arith.constant 0.001953125 : f32
    %197 = arith.mulf %196, %cst_46 : f32
    %c14 = arith.constant 14 : index
    %198 = memref.load %arg0[%c14] : memref<18xf32, #tpu.memory_space<smem>>
    %cst_47 = arith.constant 9.99999974E-6 : f32
    %199 = arith.addf %197, %cst_47 : f32
    %200 = math.rsqrt %199 : f32
    %201 = arith.mulf %198, %200 : f32
    %c17 = arith.constant 17 : index
    %202 = memref.load %arg0[%c17] : memref<18xf32, #tpu.memory_space<smem>>
    %203 = arith.mulf %201, %180 : f32
    %204 = arith.subf %202, %203 : f32
    %205 = vector.broadcast %201 : f32 to vector<1x256xf32>
    %206 = arith.mulf %205, %45 : vector<1x256xf32>
    %207 = vector.broadcast %204 : f32 to vector<1x256xf32>
    %208 = arith.addf %206, %207 : vector<1x256xf32>
    %cst_48 = arith.constant 0.000000e+00 : f32
    %209 = vector.broadcast %cst_48 : f32 to vector<1x256xf32>
    %210 = arith.maximumf %208, %209 : vector<1x256xf32>
    %211 = vector.broadcast %201 : f32 to vector<1x256xf32>
    %212 = arith.mulf %211, %90 : vector<1x256xf32>
    %213 = vector.broadcast %204 : f32 to vector<1x256xf32>
    %214 = arith.addf %212, %213 : vector<1x256xf32>
    %cst_49 = arith.constant 0.000000e+00 : f32
    %215 = vector.broadcast %cst_49 : f32 to vector<1x256xf32>
    %216 = arith.maximumf %214, %215 : vector<1x256xf32>
    %217 = vector.shape_cast %126 : vector<1x256xf32> to vector<1x1x256xf32>
    %cst_50 = arith.constant dense<0xFF800000> : vector<1xf32>
    %218 = vector.multi_reduction <maximumf>, %217, %cst_50 [1, 2] : vector<1x1x256xf32> to vector<1xf32>
    %219 = vector.shape_cast %218 : vector<1xf32> to vector<1x1x1xf32>
    %220 = vector.extract %219[0, 0, 0] : f32 from vector<1x1x1xf32>
    %221 = vector.shape_cast %168 : vector<1x256xf32> to vector<1x1x256xf32>
    %cst_51 = arith.constant dense<0xFF800000> : vector<1xf32>
    %222 = vector.multi_reduction <maximumf>, %221, %cst_51 [1, 2] : vector<1x1x256xf32> to vector<1xf32>
    %223 = vector.shape_cast %222 : vector<1xf32> to vector<1x1x1xf32>
    %224 = vector.extract %223[0, 0, 0] : f32 from vector<1x1x1xf32>
    %225 = arith.maximumf %220, %224 : f32
    %226 = vector.shape_cast %210 : vector<1x256xf32> to vector<1x1x256xf32>
    %cst_52 = arith.constant dense<0xFF800000> : vector<1xf32>
    %227 = vector.multi_reduction <maximumf>, %226, %cst_52 [1, 2] : vector<1x1x256xf32> to vector<1xf32>
    %228 = vector.shape_cast %227 : vector<1xf32> to vector<1x1x1xf32>
    %229 = vector.extract %228[0, 0, 0] : f32 from vector<1x1x1xf32>
    %230 = arith.maximumf %225, %229 : f32
    %231 = vector.shape_cast %132 : vector<1x256xf32> to vector<1x1x256xf32>
    %cst_53 = arith.constant dense<0xFF800000> : vector<1xf32>
    %232 = vector.multi_reduction <maximumf>, %231, %cst_53 [1, 2] : vector<1x1x256xf32> to vector<1xf32>
    %233 = vector.shape_cast %232 : vector<1xf32> to vector<1x1x1xf32>
    %234 = vector.extract %233[0, 0, 0] : f32 from vector<1x1x1xf32>
    %235 = arith.maximumf %230, %234 : f32
    %236 = vector.shape_cast %174 : vector<1x256xf32> to vector<1x1x256xf32>
    %cst_54 = arith.constant dense<0xFF800000> : vector<1xf32>
    %237 = vector.multi_reduction <maximumf>, %236, %cst_54 [1, 2] : vector<1x1x256xf32> to vector<1xf32>
    %238 = vector.shape_cast %237 : vector<1xf32> to vector<1x1x1xf32>
    %239 = vector.extract %238[0, 0, 0] : f32 from vector<1x1x1xf32>
    %240 = arith.maximumf %235, %239 : f32
    %241 = vector.shape_cast %216 : vector<1x256xf32> to vector<1x1x256xf32>
    %cst_55 = arith.constant dense<0xFF800000> : vector<1xf32>
    %242 = vector.multi_reduction <maximumf>, %241, %cst_55 [1, 2] : vector<1x1x256xf32> to vector<1xf32>
    %243 = vector.shape_cast %242 : vector<1xf32> to vector<1x1x1xf32>
    %244 = vector.extract %243[0, 0, 0] : f32 from vector<1x1x1xf32>
    %245 = arith.maximumf %240, %244 : f32
    %c0_i32 = arith.constant 0 : i32
    %246 = vector.broadcast %c0_i32 : i32 to vector<1x256xi32>
    %247 = arith.addi %246, %0 : vector<1x256xi32>
    %248 = vector.broadcast %245 : f32 to vector<1x256xf32>
    %249 = arith.cmpf oeq, %126, %248 : vector<1x256xf32>
    %c1536_i32 = arith.constant 1536 : i32
    %250 = vector.broadcast %c1536_i32 : i32 to vector<1x256xi32>
    %251 = arith.select %249, %247, %250 : vector<1x256xi1>, vector<1x256xi32>
    %252 = vector.shape_cast %251 : vector<1x256xi32> to vector<1x1x256xi32>
    %cst_56 = arith.constant dense<2147483647> : vector<1xi32>
    %253 = vector.multi_reduction <minsi>, %252, %cst_56 [1, 2] : vector<1x1x256xi32> to vector<1xi32>
    %254 = vector.shape_cast %253 : vector<1xi32> to vector<1x1x1xi32>
    %255 = vector.extract %254[0, 0, 0] : i32 from vector<1x1x1xi32>
    %c1536_i32_57 = arith.constant 1536 : i32
    %256 = arith.minsi %c1536_i32_57, %255 : i32
    %c256_i32 = arith.constant 256 : i32
    %257 = vector.broadcast %c256_i32 : i32 to vector<1x256xi32>
    %258 = arith.addi %257, %0 : vector<1x256xi32>
    %259 = vector.broadcast %245 : f32 to vector<1x256xf32>
    %260 = arith.cmpf oeq, %168, %259 : vector<1x256xf32>
    %c1536_i32_58 = arith.constant 1536 : i32
    %261 = vector.broadcast %c1536_i32_58 : i32 to vector<1x256xi32>
    %262 = arith.select %260, %258, %261 : vector<1x256xi1>, vector<1x256xi32>
    %263 = vector.shape_cast %262 : vector<1x256xi32> to vector<1x1x256xi32>
    %cst_59 = arith.constant dense<2147483647> : vector<1xi32>
    %264 = vector.multi_reduction <minsi>, %263, %cst_59 [1, 2] : vector<1x1x256xi32> to vector<1xi32>
    %265 = vector.shape_cast %264 : vector<1xi32> to vector<1x1x1xi32>
    %266 = vector.extract %265[0, 0, 0] : i32 from vector<1x1x1xi32>
    %267 = arith.minsi %256, %266 : i32
    %c512_i32 = arith.constant 512 : i32
    %268 = vector.broadcast %c512_i32 : i32 to vector<1x256xi32>
    %269 = arith.addi %268, %0 : vector<1x256xi32>
    %270 = vector.broadcast %245 : f32 to vector<1x256xf32>
    %271 = arith.cmpf oeq, %210, %270 : vector<1x256xf32>
    %c1536_i32_60 = arith.constant 1536 : i32
    %272 = vector.broadcast %c1536_i32_60 : i32 to vector<1x256xi32>
    %273 = arith.select %271, %269, %272 : vector<1x256xi1>, vector<1x256xi32>
    %274 = vector.shape_cast %273 : vector<1x256xi32> to vector<1x1x256xi32>
    %cst_61 = arith.constant dense<2147483647> : vector<1xi32>
    %275 = vector.multi_reduction <minsi>, %274, %cst_61 [1, 2] : vector<1x1x256xi32> to vector<1xi32>
    %276 = vector.shape_cast %275 : vector<1xi32> to vector<1x1x1xi32>
    %277 = vector.extract %276[0, 0, 0] : i32 from vector<1x1x1xi32>
    %278 = arith.minsi %267, %277 : i32
    %c768_i32 = arith.constant 768 : i32
    %279 = vector.broadcast %c768_i32 : i32 to vector<1x256xi32>
    %280 = arith.addi %279, %0 : vector<1x256xi32>
    %281 = vector.broadcast %245 : f32 to vector<1x256xf32>
    %282 = arith.cmpf oeq, %132, %281 : vector<1x256xf32>
    %c1536_i32_62 = arith.constant 1536 : i32
    %283 = vector.broadcast %c1536_i32_62 : i32 to vector<1x256xi32>
    %284 = arith.select %282, %280, %283 : vector<1x256xi1>, vector<1x256xi32>
    %285 = vector.shape_cast %284 : vector<1x256xi32> to vector<1x1x256xi32>
    %cst_63 = arith.constant dense<2147483647> : vector<1xi32>
    %286 = vector.multi_reduction <minsi>, %285, %cst_63 [1, 2] : vector<1x1x256xi32> to vector<1xi32>
    %287 = vector.shape_cast %286 : vector<1xi32> to vector<1x1x1xi32>
    %288 = vector.extract %287[0, 0, 0] : i32 from vector<1x1x1xi32>
    %289 = arith.minsi %278, %288 : i32
    %c1024_i32 = arith.constant 1024 : i32
    %290 = vector.broadcast %c1024_i32 : i32 to vector<1x256xi32>
    %291 = arith.addi %290, %0 : vector<1x256xi32>
    %292 = vector.broadcast %245 : f32 to vector<1x256xf32>
    %293 = arith.cmpf oeq, %174, %292 : vector<1x256xf32>
    %c1536_i32_64 = arith.constant 1536 : i32
    %294 = vector.broadcast %c1536_i32_64 : i32 to vector<1x256xi32>
    %295 = arith.select %293, %291, %294 : vector<1x256xi1>, vector<1x256xi32>
    %296 = vector.shape_cast %295 : vector<1x256xi32> to vector<1x1x256xi32>
    %cst_65 = arith.constant dense<2147483647> : vector<1xi32>
    %297 = vector.multi_reduction <minsi>, %296, %cst_65 [1, 2] : vector<1x1x256xi32> to vector<1xi32>
    %298 = vector.shape_cast %297 : vector<1xi32> to vector<1x1x1xi32>
    %299 = vector.extract %298[0, 0, 0] : i32 from vector<1x1x1xi32>
    %300 = arith.minsi %289, %299 : i32
    %c1280_i32 = arith.constant 1280 : i32
    %301 = vector.broadcast %c1280_i32 : i32 to vector<1x256xi32>
    %302 = arith.addi %301, %0 : vector<1x256xi32>
    %303 = vector.broadcast %245 : f32 to vector<1x256xf32>
    %304 = arith.cmpf oeq, %216, %303 : vector<1x256xf32>
    %c1536_i32_66 = arith.constant 1536 : i32
    %305 = vector.broadcast %c1536_i32_66 : i32 to vector<1x256xi32>
    %306 = arith.select %304, %302, %305 : vector<1x256xi1>, vector<1x256xi32>
    %307 = vector.shape_cast %306 : vector<1x256xi32> to vector<1x1x256xi32>
    %cst_67 = arith.constant dense<2147483647> : vector<1xi32>
    %308 = vector.multi_reduction <minsi>, %307, %cst_67 [1, 2] : vector<1x1x256xi32> to vector<1xi32>
    %309 = vector.shape_cast %308 : vector<1xi32> to vector<1x1x1xi32>
    %310 = vector.extract %309[0, 0, 0] : i32 from vector<1x1x1xi32>
    %311 = arith.minsi %300, %310 : i32
    %312 = arith.sitofp %311 : i32 to f32
    %313 = vector.broadcast %312 : f32 to vector<1x256xf32>
    %314 = arith.mulf %126, %313 : vector<1x256xf32>
    %c0_68 = arith.constant 0 : index
    %c0_69 = arith.constant 0 : index
    %315 = vector.load %arg2[%c0_68, %c0_69] : memref<6x256xf32, #tpu.memory_space<vmem>>, vector<1x256xf32>
    tpu.vector_store %arg2[%c0_68, %c0_69], %314 {strides = array<i32>} : memref<6x256xf32, #tpu.memory_space<vmem>>, vector<1x256xf32>,
    %316 = vector.broadcast %312 : f32 to vector<1x256xf32>
    %317 = arith.mulf %168, %316 : vector<1x256xf32>
    %c1_70 = arith.constant 1 : index
    %c0_71 = arith.constant 0 : index
    %318 = vector.load %arg2[%c1_70, %c0_71] : memref<6x256xf32, #tpu.memory_space<vmem>>, vector<1x256xf32>
    tpu.vector_store %arg2[%c1_70, %c0_71], %317 {strides = array<i32>} : memref<6x256xf32, #tpu.memory_space<vmem>>, vector<1x256xf32>,
    %319 = vector.broadcast %312 : f32 to vector<1x256xf32>
    %320 = arith.mulf %210, %319 : vector<1x256xf32>
    %c2_72 = arith.constant 2 : index
    %c0_73 = arith.constant 0 : index
    %321 = vector.load %arg2[%c2_72, %c0_73] : memref<6x256xf32, #tpu.memory_space<vmem>>, vector<1x256xf32>
    tpu.vector_store %arg2[%c2_72, %c0_73], %320 {strides = array<i32>} : memref<6x256xf32, #tpu.memory_space<vmem>>, vector<1x256xf32>,
    %322 = vector.broadcast %312 : f32 to vector<1x256xf32>
    %323 = arith.mulf %132, %322 : vector<1x256xf32>
    %c3_74 = arith.constant 3 : index
    %c0_75 = arith.constant 0 : index
    %324 = vector.load %arg2[%c3_74, %c0_75] : memref<6x256xf32, #tpu.memory_space<vmem>>, vector<1x256xf32>
    tpu.vector_store %arg2[%c3_74, %c0_75], %323 {strides = array<i32>} : memref<6x256xf32, #tpu.memory_space<vmem>>, vector<1x256xf32>,
    %325 = vector.broadcast %312 : f32 to vector<1x256xf32>
    %326 = arith.mulf %174, %325 : vector<1x256xf32>
    %c4_76 = arith.constant 4 : index
    %c0_77 = arith.constant 0 : index
    %327 = vector.load %arg2[%c4_76, %c0_77] : memref<6x256xf32, #tpu.memory_space<vmem>>, vector<1x256xf32>
    tpu.vector_store %arg2[%c4_76, %c0_77], %326 {strides = array<i32>} : memref<6x256xf32, #tpu.memory_space<vmem>>, vector<1x256xf32>,
    %328 = vector.broadcast %312 : f32 to vector<1x256xf32>
    %329 = arith.mulf %216, %328 : vector<1x256xf32>
    %c5_78 = arith.constant 5 : index
    %c0_79 = arith.constant 0 : index
    %330 = vector.load %arg2[%c5_78, %c0_79] : memref<6x256xf32, #tpu.memory_space<vmem>>, vector<1x256xf32>
    tpu.vector_store %arg2[%c5_78, %c0_79], %329 {strides = array<i32>} : memref<6x256xf32, #tpu.memory_space<vmem>>, vector<1x256xf32>,
    return
  }
}

</mosaic_0001>

<bundles_post_ra>
// kernel: non_differentiable_node_forward.1
= control target key start
LH: loop header
LB: loop body
LE: loop exit
PB: predicated region body
PF: predicated region fallthrough
CT: control target
= control target key end

     0   :  { %7 = vsyncpa [#allocation3], 0  ;;  %s1293_s0 = inlined_call_operand.vmem [shape: f32[18], index: 0, kind: input, shape index: {}]   ;;  %s1294_s1 = inlined_call_operand.vmem [shape: f32[6,256], index: 1, kind: input, shape index: {}]   ;;  %s1295_s2 = inlined_call_operand.vmem [shape: f32[6,256], index: 2, kind: output, shape index: {}]  }
   0x1   :  { %s14_s11 = sshll.u32 %s1293_s0, 4  ;;  %s15_s11 = int_to_ptr.vmem [resolvable:$true] %s14_s11 }
   0x2   :  { %s988_s12 = scalar_lea.vmem %s15_s11, 16  ;;  %p993_p1 = scmp.lt.s32.totalorder %s15_s11, %s15_s11 }
   0x3   :  { %p989_p0 = scmp.ne.s32.totalorder %s15_s11, %s988_s12  ;;  %p994_p2 = scmp.lt.s32.totalorder %s988_s12, %s988_s12 }
   0x5   :  { %p995_p3 = por %p994_p2, %p993_p1 }
   0x7   :  { %p996_p4 = pnand %p995_p3, %p989_p0 }
   0x9   :  { %999 = shalt.err (!%p996_p4)
}
   0xa   :  { %s1002_s13 = smov [#allocation2]  }
   0xb   :  { %17 = dma.vmem_to_smem %s15_s11, 16, %s1002_s13, [#allocation3]  }
   0xc   :  { %1000 = dma.done.wait [#allocation3], 16  }
   0xd   :  { %1001 = vsyncadd [#allocation3], 4294967280 }
   0xe   :  { %23 = sfence }
   0xf   :  { %s32_s14 = sld [smem:[#allocation2]]  ;;  %s907_s15 = sld [smem:[#allocation2 + $0x1]]  ;;  %v1025_v0 = vld [vmem:[%s1294_s1] ss:$8 sm:$0x3]  ;;  %v24_v5 = vlaneseq  ;;  %vm110_vm0 = vcmask 1040384  }
  0x10   :  { %s908_s16 = sld [smem:[#allocation2 + $0x2]]  ;;  %s909_s0 = sld [smem:[#allocation2 + $0x9]]  ;;  %v1030_v1 = vld [vmem:[%s1294_s1 + $0x1] ss:$8 sm:$0x3] }
  0x11   :  { %v1035_v2 = vld [vmem:[%s1294_s1 + $0x3] ss:$8 sm:$0x3]  ;;  %v1040_v3 = vld [vmem:[%s1294_s1 + $0x2] ss:$8 sm:$0x3] }
  0x12   :  { %v1045_v4 = vld [vmem:[%s1294_s1 + $0x4] ss:$8 sm:$0x3]  ;;  %v1050_v7 = vld [vmem:[%s1294_s1 + $0x5] ss:$8 sm:$0x3] }
  0x13   :  { %v1059_v18 = vshrl.u32 %v24_v5, 7  ;;  %s910_s1 = sld [smem:[#allocation2 + $0x3]]  ;;  %s911_s29 = sld [smem:[#allocation2 + $0x4]] }
  0x14   :  { %s912_s30 = sld [smem:[#allocation2 + $0x5]]  ;;  %s913_s3 = sld [smem:[#allocation2 + $0xa]] }
  0x15   :  { %v33_v6 = vstv %s32_s14  ;;  %v36_v9 = vstv %s907_s15  ;;  %v1066_v24 = vsub.s32 0, %v1059_v18  ;;  %v1069_v25 = vsub.s32 1, %v1059_v18  ;;  %s914_s11 = sld [smem:[#allocation2 + $0x6]]  ;;  %s915_s12 = sld [smem:[#allocation2 + $0x7]] }
  0x16   :  { %v34_v8 = vmul.f32 %v33_v6, %v1025_v0  ;;  %v40_v10 = vstv %s908_s16  ;;  %v80_v11 = vmul.f32 %v1035_v2, %v33_v6  ;;  %v37_v12 = vmul.f32 %v1030_v1, %v36_v9  ;;  %s916_s13 = sld [smem:[#allocation2 + $0x8]]  ;;  %s917_s14 = sld [smem:[#allocation2 + $0xb]] }
  0x17   :  { %v41_v13 = vmul.f32 %v1040_v3, %v40_v10  ;;  %v81_v14 = vmul.f32 %v1045_v4, %v36_v9  ;;  %v83_v15 = vmul.f32 %v1050_v7, %v40_v10  ;;  %v44_v19 = vstv %s909_s0  ;;  %s921_s22 = sld [smem:[#allocation2 + $0xc]]  ;;  %s922_s24 = sld [smem:[#allocation2 + $0xf]] }
  0x18   :  { %v38_v16 = vadd.f32 %v37_v12, %v34_v8  ;;  %s923_s27 = sld [smem:[#allocation2 + $0xd]]  ;;  %s924_s28 = sld [smem:[#allocation2 + $0x10]] }
  0x19   :  { %v82_v17 = vadd.f32 %v81_v14, %v80_v11  ;;  %v47_v39 = vstv %s910_s1  ;;  %v50_v40 = vstv %s911_s29 }
  0x1a   :  { %v42_v20 = vadd.f32 %v41_v13, %v38_v16  ;;  %v48_v41 = vmul.f32 %v47_v39, %v1025_v0  ;;  %v51_v42 = vmul.f32 %v1030_v1, %v50_v40  ;;  %v86_v43 = vmul.f32 %v1035_v2, %v47_v39 }
  0x1b   :  { %v84_v21 = vadd.f32 %v83_v15, %v82_v17  ;;  %v87_v44 = vmul.f32 %v1045_v4, %v50_v40  ;;  %v54_v45 = vstv %s912_s30  ;;  %v58_v52 = vstv %s913_s3 }
  0x1c   :  { %v1061_v22 = vadd.f32 %v44_v19, %v42_v20  ;;  %v52_v46 = vadd.f32 %v51_v42, %v48_v41  ;;  %v55_v47 = vmul.f32 %v1040_v3, %v54_v45  ;;  %v89_v49 = vmul.f32 %v1050_v7, %v54_v45 }
  0x1d   :  { %v1063_v23 = vadd.f32 %v84_v21, %v44_v19  ;;  %v88_v48 = vadd.f32 %v87_v44, %v86_v43 }
  0x1e   :  { %v56_v50 = vadd.f32 %v55_v47, %v52_v46  ;;  %v61_v47 = vstv %s914_s11  ;;  %s925_s11 = sld [smem:[#allocation2 + $0xe]] }
  0x1f   :  { %v98_v26 = vadd.f32 %v1063_v23, %v1061_v22  ;;  %v90_v51 = vadd.f32 %v89_v49, %v88_v48  ;;  %v64_v48 = vstv %s915_s12  ;;  %v62_v49 = vmul.f32 %v61_v47, %v1025_v0  ;;  %s926_s12 = sld [smem:[#allocation2 + $0x11]] }
  0x20   :  { %v1083_v53 = vadd.f32 %v58_v52, %v56_v50  ;;  %v65_v50 = vmul.f32 %v1030_v1, %v64_v48 }
  0x21   :  { %v103_v27 = vrot.slane %v98_v26, %v1066_v24  ;;  %v107_v28 = vrot.slane %v98_v26, %v1069_v25  ;;  %v1085_v54 = vadd.f32 %v90_v51, %v58_v52  ;;  %v92_v51 = vmul.f32 %v1035_v2, %v61_v47 }
  0x22   :  { %v93_v52 = vmul.f32 %v1045_v4, %v64_v48 }
  0x23   :  { %v111_v29 = vsel %vm110_vm0, %v103_v27, 0.0  ;;  %v112_v30 = vsel %vm110_vm0, %v107_v28, 0.0  ;;  %v195_v55 = vadd.f32 %v1085_v54, %v1083_v53 }
  0x24   :  { %v113_v31 = vadd.f32 %v112_v30, %v111_v29 }
  0x25   :  { %v200_v59 = vrot.slane %v195_v55, %v1066_v24  ;;  %v204_v60 = vrot.slane %v195_v55, %v1069_v25  ;;  %v68_v55 = vstv %s916_s13 }
  0x26   :  { %114 = vadd.xlane.f32.xlu0 %v113_v31 }
  0x27   :  { %v207_v10 = vsel %vm110_vm0, %v200_v59, 0.0  ;;  %v208_v11 = vsel %vm110_vm0, %v204_v60, 0.0  ;;  %v95_v59 = vmul.f32 %v1050_v7, %v68_v55 }
  0x28   :  { %v209_v19 = vadd.f32 %v208_v11, %v207_v10 }
  0xb3   :  { %v115_v32 = vpop.xlane.xlu0 %114 }
  0xb4   :  { %v116_v33 = vrot.slane %v115_v32, 4 }
  0xb6   :  { %v117_v34 = vadd.f32 %v116_v33, %v115_v32 }
  0xb8   :  { %v118_v35 = vrot.slane %v117_v34, 2 }
  0xba   :  { %v119_v36 = vadd.f32 %v118_v35, %v117_v34 }
  0xbc   :  { %v120_v37 = vrot.slane %v119_v36, 1 }
  0xbe   :  { %v121_v38 = vadd.f32 %v120_v37, %v119_v36 }
  0xc0   :  { %932 = vpush %v121_v38 }
  0xf1   :  { %s1087_s4 = spop %932 }
  0xf2   :  { %s123_s5 = smul.f32 0.001953125, %s1087_s4 }
  0xf4   :  { %v124_v56 = vstv %s123_s5 }
  0xf5   :  { %v125_v57 = vsub.f32 %v1061_v22, %v124_v56  ;;  %v151_v58 = vsub.f32 %v1063_v23, %v124_v56  ;;  %v66_v56 = vadd.f32 %v65_v50, %v62_v49 }
  0xf7   :  { %v126_v61 = vmul.f32 %v125_v57, %v125_v57  ;;  %v152_v62 = vmul.f32 %v151_v58, %v151_v58  ;;  %v69_v57 = vmul.f32 %v1040_v3, %v68_v55  ;;  %v94_v58 = vadd.f32 %v93_v52, %v92_v51 }
  0xf9   :  { %v157_v63 = vrot.slane %v152_v62, %v1066_v24  ;;  %v161_v6 = vrot.slane %v152_v62, %v1069_v25  ;;  %v131_v8 = vrot.slane %v126_v61, %v1066_v24  ;;  %v135_v9 = vrot.slane %v126_v61, %v1069_v25 }
  0xfa   :  { %v70_v60 = vadd.f32 %v69_v57, %v66_v56  ;;  %v96_v61 = vadd.f32 %v95_v59, %v94_v58  ;;  %v72_v62 = vstv %s917_s14 }
  0xfb   :  { %v164_v12 = vsel %vm110_vm0, %v157_v63, 0.0  ;;  %v165_v13 = vsel %vm110_vm0, %v161_v6, 0.0  ;;  %v138_v14 = vsel %vm110_vm0, %v131_v8, 0.0  ;;  %v139_v15 = vsel %vm110_vm0, %v135_v9, 0.0 }
  0xfc   :  { %v166_v16 = vadd.f32 %v165_v13, %v164_v12  ;;  %v140_v17 = vadd.f32 %v139_v15, %v138_v14  ;;  %v1114_v63 = vadd.f32 %v72_v62, %v70_v60  ;;  %v1116_v0 = vadd.f32 %v96_v61, %v72_v62 }
  0xfe   :  { %167 = vadd.xlane.f32.xlu1 %v166_v16  ;;  %141 = vadd.xlane.f32.xlu0 %v140_v17  ;;  %v291_v1 = vadd.f32 %v1116_v0, %v1114_v63 }
 0x100   :  { %v296_v7 = vrot.slane %v291_v1, %v1066_v24  ;;  %v300_v6 = vrot.slane %v291_v1, %v1069_v25 }
 0x102   :  { %210 = vadd.xlane.f32.xlu1 %v209_v19  ;;  %v303_v14 = vsel %vm110_vm0, %v296_v7, 0.0  ;;  %v304_v15 = vsel %vm110_vm0, %v300_v6, 0.0 }
 0x18b   :  { %v168_v20 = vpop.xlane.xlu1 %167  ;;  %v142_v21 = vpop.xlane.xlu0 %141 }
 0x18c   :  { %v169_v26 = vrot.slane %v168_v20, 4  ;;  %v143_v27 = vrot.slane %v142_v21, 4 }
 0x18e   :  { %v170_v28 = vadd.f32 %v169_v26, %v168_v20  ;;  %v144_v29 = vadd.f32 %v143_v27, %v142_v21  ;;  %v305_v27 = vadd.f32 %v304_v15, %v303_v14 }
 0x18f   :  { %v211_v38 = vpop.xlane.xlu1 %210 }
 0x190   :  { %v171_v30 = vrot.slane %v170_v28, 2  ;;  %v145_v31 = vrot.slane %v144_v29, 2  ;;  %v212_v39 = vrot.slane %v211_v38, 4 }
 0x192   :  { %v146_v32 = vadd.f32 %v145_v31, %v144_v29  ;;  %v172_v33 = vadd.f32 %v171_v30, %v170_v28  ;;  %v213_v40 = vadd.f32 %v212_v39, %v211_v38 }
 0x194   :  { %v147_v34 = vrot.slane %v146_v32, 1  ;;  %v173_v35 = vrot.slane %v172_v33, 1  ;;  %v214_v41 = vrot.slane %v213_v40, 2 }
 0x196   :  { %v148_v36 = vadd.f32 %v147_v34, %v146_v32  ;;  %v174_v37 = vadd.f32 %v173_v35, %v172_v33  ;;  %v215_v43 = vadd.f32 %v214_v41, %v213_v40 }
 0x198   :  { %934 = vpush %v148_v36  ;;  %v216_v44 = vrot.slane %v215_v43, 1 }
 0x199   :  { %936 = vpush %v174_v37 }
 0x19a   :  { %v217_v46 = vadd.f32 %v216_v44, %v215_v43 }
 0x1c9   :  { %s935_s6 = spop %934 }
 0x1ca   :  { %s937_s7 = spop %936 }
 0x1cb   :  { %s176_s8 = sadd.f32 %s937_s7, %s935_s6 }
 0x1cd   :  { %s177_s9 = smul.f32 0.001953125, %s176_s8 }
 0x1cf   :  { %s179_s10 = sadd.f32 1e-05, %s177_s9 }
 0x1d1   :  { %v180_v42 = vstv %s179_s10 }
 0x1d2   :  { %982 = vrsqrt.f32 %v180_v42 }
 0x1dc   :  { %v983_v45 = vpop.eup %982 }
 0x1dd   :  { %938 = vpush %v983_v45 }
 0x1de   :  { %940 = vpush %v217_v46 }
 0x20e   :  { %s1118_s15 = spop %938 }
 0x20f   :  { %s1120_s16 = spop %940  ;;  %s183_s23 = smul.f32 %s1118_s15, %s921_s22 }
 0x210   :  { %s219_s17 = smul.f32 0.001953125, %s1120_s16 }
 0x211   :  { %s185_s25 = smul.f32 %s183_s23, %s123_s5  ;;  %v187_v51 = vstv %s183_s23 }
 0x212   :  { %v220_v2 = vstv %s219_s17  ;;  %v192_v55 = vmul.f32 %v187_v51, %v1063_v23  ;;  %v188_v56 = vmul.f32 %v187_v51, %v1061_v22 }
 0x213   :  { %v221_v3 = vsub.f32 %v1083_v53, %v220_v2  ;;  %v247_v4 = vsub.f32 %v1085_v54, %v220_v2  ;;  %s186_s26 = ssub.f32 %s922_s24, %s185_s25 }
 0x215   :  { %v222_v8 = vmul.f32 %v221_v3, %v221_v3  ;;  %v248_v9 = vmul.f32 %v247_v4, %v247_v4  ;;  %v189_v52 = vstv %s186_s26 }
 0x216   :  { %v193_v57 = vadd.f32 %v192_v55, %v189_v52  ;;  %v190_v58 = vadd.f32 %v189_v52, %v188_v56 }
 0x217   :  { %v253_v10 = vrot.slane %v248_v9, %v1066_v24  ;;  %v257_v11 = vrot.slane %v248_v9, %v1069_v25  ;;  %v227_v12 = vrot.slane %v222_v8, %v1066_v24  ;;  %v231_v13 = vrot.slane %v222_v8, %v1069_v25 }
 0x218   :  { %v1148_v59 = vmax.f32 %v193_v57, 0.0  ;;  %v1153_v61 = vmax.f32 %v190_v58, 0.0 }
 0x219   :  { %v260_v16 = vsel %vm110_vm0, %v253_v10, 0.0  ;;  %v261_v17 = vsel %vm110_vm0, %v257_v11, 0.0  ;;  %v234_v19 = vsel %vm110_vm0, %v227_v12, 0.0  ;;  %v235_v20 = vsel %vm110_vm0, %v231_v13, 0.0 }
 0x21a   :  { %v262_v21 = vadd.f32 %v261_v17, %v260_v16  ;;  %v236_v26 = vadd.f32 %v235_v20, %v234_v19  ;;  %v462_v3 = vrot.slane %v1148_v59, %v1066_v24  ;;  %v466_v8 = vrot.slane %v1148_v59, %v1069_v25 }
 0x21b   :  { %v391_v11 = vrot.slane %v1153_v61, %v1066_v24 }
 0x21c   :  { %263 = vadd.xlane.f32.xlu1 %v262_v21  ;;  %237 = vadd.xlane.f32.xlu0 %v236_v26 }
 0x220   :  { %306 = vadd.xlane.f32.xlu0 %v305_v27  ;;  %v469_v27 = vsel %vm110_vm0, %v462_v3, -inf }
 0x2a9   :  { %v264_v28 = vpop.xlane.xlu1 %263  ;;  %v238_v29 = vpop.xlane.xlu0 %237 }
 0x2aa   :  { %v265_v30 = vrot.slane %v264_v28, 4  ;;  %v239_v31 = vrot.slane %v238_v29, 4 }
 0x2ac   :  { %v266_v32 = vadd.f32 %v265_v30, %v264_v28  ;;  %v240_v33 = vadd.f32 %v239_v31, %v238_v29  ;;  %v470_v28 = vsel %vm110_vm0, %v466_v8, -inf  ;;  %v398_v29 = vsel %vm110_vm0, %v391_v11, -inf }
 0x2ad   :  { %v307_v42 = vpop.xlane.xlu0 %306 }
 0x2ae   :  { %v267_v34 = vrot.slane %v266_v32, 2  ;;  %v241_v35 = vrot.slane %v240_v33, 2  ;;  %v308_v43 = vrot.slane %v307_v42, 4 }
 0x2b0   :  { %v242_v36 = vadd.f32 %v241_v35, %v240_v33  ;;  %v268_v37 = vadd.f32 %v267_v34, %v266_v32  ;;  %v309_v44 = vadd.f32 %v308_v43, %v307_v42  ;;  %v471_v33 = vmax.f32 %v469_v27, %v470_v28 }
 0x2b2   :  { %v243_v38 = vrot.slane %v242_v36, 1  ;;  %v269_v39 = vrot.slane %v268_v37, 1  ;;  %v310_v45 = vrot.slane %v309_v44, 2 }
 0x2b4   :  { %v244_v40 = vadd.f32 %v243_v38, %v242_v36  ;;  %v270_v41 = vadd.f32 %v269_v39, %v268_v37  ;;  %v311_v47 = vadd.f32 %v310_v45, %v309_v44 }
 0x2b6   :  { %942 = vpush %v244_v40  ;;  %v312_v48 = vrot.slane %v311_v47, 1 }
 0x2b7   :  { %944 = vpush %v270_v41 }
 0x2b8   :  { %v313_v50 = vadd.f32 %v312_v48, %v311_v47 }
 0x2e7   :  { %s943_s18 = spop %942 }
 0x2e8   :  { %s945_s0 = spop %944 }
 0x2e9   :  { %s272_s19 = sadd.f32 %s945_s0, %s943_s18 }
 0x2eb   :  { %s273_s20 = smul.f32 0.001953125, %s272_s19 }
 0x2ed   :  { %s275_s21 = sadd.f32 1e-05, %s273_s20 }
 0x2ef   :  { %v276_v46 = vstv %s275_s21 }
 0x2f0   :  { %984 = vrsqrt.f32 %v276_v46 }
 0x2fa   :  { %v985_v49 = vpop.eup %984 }
 0x2fb   :  { %946 = vpush %v985_v49 }
 0x2fc   :  { %948 = vpush %v313_v50 }
 0x32c   :  { %s947_s1 = spop %946 }
 0x32d   :  { %s279_s29 = smul.f32 %s947_s1, %s923_s27  ;;  %s1146_s30 = spop %948 }
 0x32e   :  { %s315_s3 = smul.f32 0.001953125, %s1146_s30 }
 0x32f   :  { %s281_s4 = smul.f32 %s279_s29, %s219_s17  ;;  %v283_v60 = vstv %s279_s29 }
 0x330   :  { %v316_v23 = vstv %s315_s3  ;;  %v284_v1 = vmul.f32 %v283_v60, %v1083_v53  ;;  %v288_v2 = vmul.f32 %v283_v60, %v1085_v54  ;;  %v395_v53 = vrot.slane %v1153_v61, %v1069_v25 }
 0x331   :  { %s282_s5 = ssub.f32 %s924_s28, %s281_s4  ;;  %v317_v22 = vsub.f32 %v1114_v63, %v316_v23  ;;  %v343_v62 = vsub.f32 %v1116_v0, %v316_v23 }
 0x332   :  { %v399_v30 = vsel %vm110_vm0, %v395_v53, -inf }
 0x333   :  { %v285_v4 = vstv %s282_s5  ;;  %v318_v7 = vmul.f32 %v317_v22, %v317_v22  ;;  %v344_v6 = vmul.f32 %v343_v62, %v343_v62  ;;  %v400_v34 = vmax.f32 %v398_v29, %v399_v30 }
 0x334   :  { %v286_v9 = vadd.f32 %v285_v4, %v284_v1  ;;  %v1165_v10 = vadd.f32 %v288_v2, %v285_v4 }
 0x335   :  { %v349_v54 = vrot.slane %v344_v6, %v1066_v24  ;;  %v353_v12 = vrot.slane %v344_v6, %v1069_v25  ;;  %v323_v13 = vrot.slane %v318_v7, %v1066_v24  ;;  %v327_v14 = vrot.slane %v318_v7, %v1069_v25 }
 0x336   :  { %v1175_v15 = vmax.f32 %v286_v9, 0.0 }
 0x337   :  { %v356_v16 = vsel %vm110_vm0, %v349_v54, 0.0  ;;  %v357_v17 = vsel %vm110_vm0, %v353_v12, 0.0  ;;  %v330_v19 = vsel %vm110_vm0, %v323_v13, 0.0  ;;  %v331_v20 = vsel %vm110_vm0, %v327_v14, 0.0 }
 0x338   :  { %v358_v21 = vadd.f32 %v357_v17, %v356_v16  ;;  %v332_v26 = vadd.f32 %v331_v20, %v330_v19  ;;  %v414_v31 = vrot.slane %v1175_v15, %v1066_v24  ;;  %v418_v32 = vrot.slane %v1175_v15, %v1069_v25 }
 0x339   :  { %v1196_v12 = vmax.f32 %v1165_v10, 0.0 }
 0x33a   :  { %359 = vadd.xlane.f32.xlu0 %v358_v21  ;;  %333 = vadd.xlane.f32.xlu1 %v332_v26  ;;  %v421_v35 = vsel %vm110_vm0, %v414_v31, -inf  ;;  %v422_v36 = vsel %vm110_vm0, %v418_v32, -inf }
 0x33b   :  { %v423_v37 = vmax.f32 %v421_v35, %v422_v36  ;;  %v486_v20 = vrot.slane %v1196_v12, %v1066_v24  ;;  %v490_v21 = vrot.slane %v1196_v12, %v1069_v25 }
 0x33e   :  { %472 = vmax.xlane.f32.xlu0 %v471_v33  ;;  %401 = vmax.xlane.f32.xlu1 %v400_v34  ;;  %v493_v33 = vsel %vm110_vm0, %v486_v20, -inf  ;;  %v494_v34 = vsel %vm110_vm0, %v490_v21, -inf }
 0x33f   :  { %v495_v35 = vmax.f32 %v493_v33, %v494_v34 }
 0x342   :  { %424 = vmax.xlane.f32.xlu0 %v423_v37 }
 0x3c7   :  { %v360_v38 = vpop.xlane.xlu0 %359  ;;  %v334_v39 = vpop.xlane.xlu1 %333 }
 0x3c8   :  { %v361_v40 = vrot.slane %v360_v38, 4  ;;  %v335_v41 = vrot.slane %v334_v39, 4 }
 0x3ca   :  { %v362_v42 = vadd.f32 %v361_v40, %v360_v38  ;;  %v336_v43 = vadd.f32 %v335_v41, %v334_v39 }
 0x3cb   :  { %v473_v52 = vpop.xlane.xlu0 %472  ;;  %v402_v55 = vpop.xlane.xlu1 %401 }
 0x3cc   :  { %v363_v44 = vrot.slane %v362_v42, 2  ;;  %v337_v45 = vrot.slane %v336_v43, 2  ;;  %v403_v57 = vrot.slane %v402_v55, 4  ;;  %v474_v36 = vrot.slane %v473_v52, 4 }
 0x3ce   :  { %v338_v46 = vadd.f32 %v337_v45, %v336_v43  ;;  %v364_v47 = vadd.f32 %v363_v44, %v362_v42  ;;  %v404_v60 = vmax.f32 %v402_v55, %v403_v57  ;;  %v475_v37 = vmax.f32 %v473_v52, %v474_v36 }
 0x3cf   :  { %v425_v56 = vpop.xlane.xlu0 %424 }
 0x3d0   :  { %v339_v48 = vrot.slane %v338_v46, 1  ;;  %v365_v49 = vrot.slane %v364_v47, 1  ;;  %v426_v58 = vrot.slane %v425_v56, 4  ;;  %v405_v22 = vrot.slane %v404_v60, 2 }
 0x3d1   :  { %v476_v38 = vrot.slane %v475_v37, 2 }
 0x3d2   :  { %v340_v50 = vadd.f32 %v339_v48, %v338_v46  ;;  %v366_v51 = vadd.f32 %v365_v49, %v364_v47  ;;  %v427_v23 = vmax.f32 %v425_v56, %v426_v58  ;;  %v406_v2 = vmax.f32 %v404_v60, %v405_v22 }
 0x3d3   :  { %v477_v46 = vmax.f32 %v475_v37, %v476_v38 }
 0x3d4   :  { %950 = vpush %v340_v50  ;;  %v428_v62 = vrot.slane %v427_v23, 2  ;;  %v407_v4 = vrot.slane %v406_v2, 1 }
 0x3d5   :  { %952 = vpush %v366_v51  ;;  %v478_v55 = vrot.slane %v477_v46, 1 }
 0x3d6   :  { %v429_v3 = vmax.f32 %v427_v23, %v428_v62  ;;  %v408_v8 = vmax.f32 %v406_v2, %v407_v4 }
 0x3d7   :  { %v479_v23 = vmax.f32 %v477_v46, %v478_v55 }
 0x3d8   :  { %v430_v7 = vrot.slane %v429_v3, 1 }
 0x3da   :  { %v431_v9 = vmax.f32 %v429_v3, %v430_v7  ;;  %v25_v3 = vand.u32 127, %v24_v5  ;;  %v1003_v7 = vmov 1966171168  }
 0x3dc   :  { %v26_v4 = vadd.s32 128, %v25_v3  ;;  %v757_v21 = vadd.s32 1024, %v25_v3 }
 0x3de   :  { %v815_v20 = vadd.s32 1280, %v26_v4 }
 0x405   :  { %s951_s6 = spop %950 }
 0x406   :  { %s953_s7 = spop %952 }
 0x407   :  { %s368_s8 = sadd.f32 %s953_s7, %s951_s6 }
 0x409   :  { %s369_s9 = smul.f32 0.001953125, %s368_s8 }
 0x40b   :  { %s371_s10 = sadd.f32 1e-05, %s369_s9 }
 0x40d   :  { %v372_v1 = vstv %s371_s10 }
 0x40e   :  { %986 = vrsqrt.f32 %v372_v1 }
 0x418   :  { %v987_v6 = vpop.eup %986 }
 0x419   :  { %954 = vpush %v987_v6  ;;  %v534_v6 = vunpack.c.l.s4 %v1003_v7 }
 0x41a   :  { %956 = vpush %v408_v8 }
 0x41b   :  { %958 = vpush %v431_v9  ;;  %v535_v8 = vunpack.c.0.s8 %v534_v6  ;;  %v586_v9 = vadd.s32 256, %v25_v3 }
 0x44a   :  { %s955_s13 = spop %954 }
 0x44b   :  { %s375_s14 = smul.f32 %s955_s13, %s925_s11  ;;  %s957_s17 = spop %956 }
 0x44c   :  { %s959_s18 = spop %958 }
 0x44d   :  { %s377_s15 = smul.f32 %s375_s14, %s315_s3  ;;  %v379_v11 = vstv %s375_s14  ;;  %s433_s0 = smax.f32 %s959_s18, %s957_s17 }
 0x44e   :  { %v380_v53 = vmul.f32 %v379_v11, %v1114_v63  ;;  %v384_v54 = vmul.f32 %v379_v11, %v1116_v0  ;;  %v587_v11 = vadd.s32 256, %v26_v4 }
 0x44f   :  { %s378_s16 = ssub.f32 %s926_s12, %s377_s15 }
 0x451   :  { %v381_v13 = vstv %s378_s16 }
 0x452   :  { %v382_v14 = vadd.f32 %v381_v13, %v380_v53  ;;  %v385_v16 = vadd.f32 %v384_v54, %v381_v13  ;;  %v700_v53 = vadd.s32 768, %v25_v3  ;;  %v701_v54 = vadd.s32 768, %v26_v4 }
 0x453   :  { %v643_v13 = vadd.s32 512, %v25_v3 }
 0x454   :  { %v1198_v17 = vmax.f32 %v382_v14, 0.0  ;;  %v1200_v19 = vmax.f32 %v385_v16, 0.0  ;;  %v644_v14 = vadd.s32 512, %v26_v4  ;;  %v814_v16 = vadd.s32 1280, %v25_v3 }
 0x456   :  { %v510_v63 = vrot.slane %v1200_v19, %v1066_v24  ;;  %v514_v0 = vrot.slane %v1200_v19, %v1069_v25  ;;  %v438_v10 = vrot.slane %v1198_v17, %v1066_v24  ;;  %v442_v26 = vrot.slane %v1198_v17, %v1069_v25 }
 0x458   :  { %v517_v27 = vsel %vm110_vm0, %v510_v63, -inf  ;;  %v518_v28 = vsel %vm110_vm0, %v514_v0, -inf  ;;  %v445_v29 = vsel %vm110_vm0, %v438_v10, -inf  ;;  %v446_v30 = vsel %vm110_vm0, %v442_v26, -inf }
 0x459   :  { %v519_v31 = vmax.f32 %v517_v27, %v518_v28  ;;  %v447_v32 = vmax.f32 %v445_v29, %v446_v30  ;;  %v758_v63 = vadd.s32 1024, %v26_v4  ;;  %v1222_v0 = vsub.s32 %v535_v8, %v1059_v18 }
 0x45a   :  { %v589_v10 = vcombine.low %v586_v9, %v587_v11  ;;  %v532_v26 = vcombine.low %v25_v3, %v26_v4  ;;  %v703_v27 = vcombine.low %v700_v53, %v701_v54  ;;  %v646_v28 = vcombine.low %v643_v13, %v644_v14 }
 0x45b   :  { %520 = vmax.xlane.f32.xlu0 %v519_v31  ;;  %448 = vmax.xlane.f32.xlu1 %v447_v32  ;;  %v817_v29 = vcombine.low %v814_v16, %v815_v20  ;;  %v760_v30 = vcombine.low %v757_v21, %v758_v63 }
 0x45c   :  { %v596_v31 = vrot.slane %v589_v10, %v1222_v0  ;;  %v539_v32 = vrot.slane %v532_v26, %v1222_v0  ;;  %v710_v33 = vrot.slane %v703_v27, %v1222_v0  ;;  %v653_v18 = vrot.slane %v646_v28, %v1222_v0 }
 0x45d   :  { %v824_v34 = vrot.slane %v817_v29, %v1222_v0 }
 0x45e   :  { %v603_v36 = vrot.slane %v596_v31, %v1222_v0  ;;  %v546_v37 = vrot.slane %v539_v32, %v1222_v0  ;;  %v717_v38 = vrot.slane %v710_v33, %v1222_v0 }
 0x45f   :  { %496 = vmax.xlane.f32.xlu1 %v495_v35  ;;  %v767_v35 = vrot.slane %v760_v30, %v1222_v0 }
 0x4e8   :  { %v521_v39 = vpop.xlane.xlu0 %520  ;;  %v449_v40 = vpop.xlane.xlu1 %448 }
 0x4e9   :  { %v522_v41 = vrot.slane %v521_v39, 4  ;;  %v450_v42 = vrot.slane %v449_v40, 4 }
 0x4eb   :  { %v523_v43 = vmax.f32 %v521_v39, %v522_v41  ;;  %v451_v44 = vmax.f32 %v449_v40, %v450_v42  ;;  %v660_v39 = vrot.slane %v653_v18, %v1222_v0  ;;  %v831_v41 = vrot.slane %v824_v34, %v1222_v0 }
 0x4ec   :  { %v497_v45 = vpop.xlane.xlu1 %496  ;;  %v774_v42 = vrot.slane %v767_v35, %v1222_v0 }
 0x4ed   :  { %v524_v47 = vrot.slane %v523_v43, 2  ;;  %v452_v48 = vrot.slane %v451_v44, 2  ;;  %v498_v49 = vrot.slane %v497_v45, 4 }
 0x4ef   :  { %v499_v50 = vmax.f32 %v497_v45, %v498_v49  ;;  %v453_v51 = vmax.f32 %v451_v44, %v452_v48  ;;  %v525_v56 = vmax.f32 %v523_v43, %v524_v47 }
 0x4f1   :  { %v500_v57 = vrot.slane %v499_v50, 2  ;;  %v454_v58 = vrot.slane %v453_v51, 1  ;;  %v526_v22 = vrot.slane %v525_v56, 1 }
 0x4f3   :  { %v455_v60 = vmax.f32 %v453_v51, %v454_v58  ;;  %v501_v52 = vmax.f32 %v499_v50, %v500_v57  ;;  %v527_v2 = vmax.f32 %v525_v56, %v526_v22 }
 0x4f5   :  { %960 = vpush %v455_v60  ;;  %v502_v62 = vrot.slane %v501_v52, 1 }
 0x4f6   :  { %962 = vpush %v479_v23 }
 0x4f7   :  { %v503_v1 = vmax.f32 %v501_v52, %v502_v62 }
 0x4f9   :  { %964 = vpush %v503_v1 }
 0x4fa   :  { %966 = vpush %v527_v2 }
 0x526   :  { %s961_s19 = spop %960 }
 0x527   :  { %s457_s20 = smax.f32 %s961_s19, %s433_s0  ;;  %s963_s21 = spop %962 }
 0x528   :  { %s481_s22 = smax.f32 %s963_s21, %s457_s20 }
 0x52a   :  { %s965_s23 = spop %964 }
 0x52b   :  { %s505_s24 = smax.f32 %s965_s23, %s481_s22  ;;  %s967_s25 = spop %966 }
 0x52c   :  { %s529_s26 = smax.f32 %s967_s25, %s505_s24 }
 0x52d   :  { %v530_v40 = vstv %s529_s26 }
 0x52e   :  { %vm588_vm1 = vcmp.eq.f32.partialorder %v1175_v15, %v530_v40  ;;  %vm531_vm2 = vcmp.eq.f32.partialorder %v1153_v61, %v530_v40  ;;  %vm702_vm3 = vcmp.eq.f32.partialorder %v1148_v59, %v530_v40  ;;  %vm645_vm4 = vcmp.eq.f32.partialorder %v1198_v17, %v530_v40 }
 0x52f   :  { %v604_v43 = vsel %vm588_vm1, %v603_v36, 1536  ;;  %v547_v44 = vsel %vm531_vm2, %v546_v37, 1536  ;;  %v718_v45 = vsel %vm702_vm3, %v717_v38, 1536  ;;  %v661_v46 = vsel %vm645_vm4, %v660_v39, 1536 }
 0x530   :  { %v608_v47 = vrot.slane %v604_v43, %v1066_v24  ;;  %v612_v48 = vrot.slane %v604_v43, %v1069_v25  ;;  %v551_v49 = vrot.slane %v547_v44, %v1066_v24  ;;  %v555_v50 = vrot.slane %v547_v44, %v1069_v25 }
 0x531   :  { %v722_v51 = vrot.slane %v718_v45, %v1066_v24  ;;  %v726_v55 = vrot.slane %v718_v45, %v1069_v25  ;;  %v665_v56 = vrot.slane %v661_v46, %v1066_v24  ;;  %v669_v57 = vrot.slane %v661_v46, %v1069_v25 }
 0x532   :  { %v613_v58 = vsel %vm110_vm0, %v608_v47, 2147483647  ;;  %v614_v60 = vsel %vm110_vm0, %v612_v48, 2147483647  ;;  %v556_v52 = vsel %vm110_vm0, %v551_v49, 2147483647  ;;  %vm816_vm5 = vcmp.eq.f32.partialorder %v1200_v19, %v530_v40 }
 0x533   :  { %vm615_vm6 = vcmp.lt.s32.totalorder %v613_v58, %v614_v60  ;;  %v557_v23 = vsel %vm110_vm0, %v555_v50, 2147483647  ;;  %v727_v22 = vsel %vm110_vm0, %v722_v51, 2147483647  ;;  %v728_v62 = vsel %vm110_vm0, %v726_v55, 2147483647 }
 0x534   :  { %v616_v1 = vsel %vm615_vm6, %v613_v58, %v614_v60  ;;  %vm558_vm7 = vcmp.lt.s32.totalorder %v556_v52, %v557_v23  ;;  %vm729_vm8 = vcmp.lt.s32.totalorder %v727_v22, %v728_v62  ;;  %v670_v2 = vsel %vm110_vm0, %v665_v56, 2147483647 }
 0x535   :  { %v618_v3 = vshra.s32 %v616_v1, 16  ;;  %v559_v4 = vsel %vm558_vm7, %v556_v52, %v557_v23  ;;  %v730_v7 = vsel %vm729_vm8, %v727_v22, %v728_v62  ;;  %v671_v6 = vsel %vm110_vm0, %v669_v57, 2147483647 }
 0x536   :  { %v561_v8 = vshra.s32 %v559_v4, 16  ;;  %v732_v9 = vshra.s32 %v730_v7, 16  ;;  %vm672_vm9 = vcmp.lt.s32.totalorder %v670_v2, %v671_v6  ;;  %v832_v11 = vsel %vm816_vm5, %v831_v41, 1536 }
 0x537   :  { %v620_v53 = vcvt.s32.f32 %v618_v3  ;;  %v673_v54 = vsel %vm672_vm9, %v670_v2, %v671_v6  ;;  %v836_v13 = vrot.slane %v832_v11, %v1066_v24  ;;  %v840_v14 = vrot.slane %v832_v11, %v1069_v25 }
 0x538   :  { %v563_v16 = vcvt.s32.f32 %v561_v8  ;;  %v675_v20 = vshra.s32 %v673_v54, 16  ;;  %vm759_vm10 = vcmp.eq.f32.partialorder %v1196_v12, %v530_v40  ;;  %v734_v27 = vcvt.s32.f32 %v732_v9 }
 0x539   :  { %621 = vmin.xlane.f32.xlu0 %v620_v53  ;;  %v841_v21 = vsel %vm110_vm0, %v836_v13, 2147483647  ;;  %v842_v63 = vsel %vm110_vm0, %v840_v14, 2147483647  ;;  %v775_v0 = vsel %vm759_vm10, %v774_v42, 1536  ;;  %v560_v36 = vand.u32 65535, %v559_v4 }
 0x53a   :  { %564 = vmin.xlane.f32.xlu1 %v563_v16  ;;  %vm843_vm11 = vcmp.lt.s32.totalorder %v841_v21, %v842_v63  ;;  %v779_v10 = vrot.slane %v775_v0, %v1066_v24  ;;  %v783_v26 = vrot.slane %v775_v0, %v1069_v25  ;;  %v677_v29 = vcvt.s32.f32 %v675_v20 }
 0x53b   :  { %v844_v28 = vsel %vm843_vm11, %v841_v21, %v842_v63  ;;  %v617_v24 = vand.u32 65535, %v616_v1  ;;  %v731_v38 = vand.u32 65535, %v730_v7  ;;  %v562_v40 = vcvt.s32.f32 %v560_v36 }
 0x53c   :  { %v846_v30 = vshra.s32 %v844_v28, 16  ;;  %v784_v31 = vsel %vm110_vm0, %v779_v10, 2147483647  ;;  %v785_v32 = vsel %vm110_vm0, %v783_v26, 2147483647  ;;  %v674_v41 = vand.u32 65535, %v673_v54 }
 0x53d   :  { %735 = vmin.xlane.f32.xlu0 %v734_v27  ;;  %vm786_vm12 = vcmp.lt.s32.totalorder %v784_v31, %v785_v32  ;;  %v619_v37 = vcvt.s32.f32 %v617_v24  ;;  %v733_v45 = vcvt.s32.f32 %v731_v38  ;;  %v845_v46 = vand.u32 65535, %v844_v28 }
 0x53e   :  { %678 = vmin.xlane.f32.xlu1 %v677_v29  ;;  %v787_v33 = vsel %vm786_vm12, %v784_v31, %v785_v32  ;;  %v848_v18 = vcvt.s32.f32 %v846_v30  ;;  %v676_v48 = vcvt.s32.f32 %v674_v41 }
 0x53f   :  { %v789_v34 = vshra.s32 %v787_v33, 16  ;;  %v788_v50 = vand.u32 65535, %v787_v33  ;;  %v847_v56 = vcvt.s32.f32 %v845_v46 }
 0x541   :  { %849 = vmin.xlane.f32.xlu0 %v848_v18  ;;  %v791_v35 = vcvt.s32.f32 %v789_v34  ;;  %v790_v60 = vcvt.s32.f32 %v788_v50 }
 0x543   :  { %792 = vmin.xlane.f32.xlu1 %v791_v35 }
 0x5c6   :  { %v622_v25 = vpop.xlane.xlu0 %621 }
 0x5c7   :  { %v565_v39 = vpop.xlane.xlu1 %564  ;;  %vm623_vm13 = vcmp.eq.f32.partialorder %v620_v53, %v622_v25  ;;  %v628_v23 = vcvt.f32.s32 %v622_v25 }
 0x5c8   :  { %v624_v42 = vsel %vm623_vm13, %v619_v37, inf  ;;  %vm566_vm14 = vcmp.eq.f32.partialorder %v563_v16, %v565_v39  ;;  %v571_v22 = vcvt.f32.s32 %v565_v39 }
 0x5c9   :  { %625 = vmin.xlane.f32.xlu0 %v624_v42  ;;  %v567_v43 = vsel %vm566_vm14, %v562_v40, inf  ;;  %v629_v1 = vshll.u32 %v628_v23, 16 }
 0x5ca   :  { %568 = vmin.xlane.f32.xlu1 %v567_v43  ;;  %v736_v44 = vpop.xlane.xlu0 %735  ;;  %v572_v7 = vshll.u32 %v571_v22, 16 }
 0x5cb   :  { %v679_v47 = vpop.xlane.xlu1 %678  ;;  %vm737_vm15 = vcmp.eq.f32.partialorder %v734_v27, %v736_v44  ;;  %v742_v2 = vcvt.f32.s32 %v736_v44 }
 0x5cc   :  { %v738_v49 = vsel %vm737_vm15, %v733_v45, inf  ;;  %vm680_vm0 = vcmp.eq.f32.partialorder %v677_v29, %v679_v47  ;;  %v685_v6 = vcvt.f32.s32 %v679_v47 }
 0x5cd   :  { %739 = vmin.xlane.f32.xlu0 %v738_v49  ;;  %v681_v51 = vsel %vm680_vm0, %v676_v48, inf  ;;  %v743_v13 = vshll.u32 %v742_v2, 16 }
 0x5ce   :  { %682 = vmin.xlane.f32.xlu1 %v681_v51  ;;  %v850_v55 = vpop.xlane.xlu0 %849  ;;  %v686_v21 = vshll.u32 %v685_v6, 16 }
 0x5cf   :  { %vm851_vm1 = vcmp.eq.f32.partialorder %v848_v18, %v850_v55  ;;  %v856_v11 = vcvt.f32.s32 %v850_v55 }
 0x5d0   :  { %v793_v57 = vpop.xlane.xlu1 %792  ;;  %v852_v58 = vsel %vm851_vm1, %v847_v56, inf }
 0x5d1   :  { %853 = vmin.xlane.f32.xlu0 %v852_v58  ;;  %vm794_vm2 = vcmp.eq.f32.partialorder %v791_v35, %v793_v57  ;;  %v799_v63 = vcvt.f32.s32 %v793_v57  ;;  %v857_v27 = vshll.u32 %v856_v11, 16 }
 0x5d2   :  { %v795_v52 = vsel %vm794_vm2, %v790_v60, inf }
 0x5d3   :  { %796 = vmin.xlane.f32.xlu1 %v795_v52  ;;  %v800_v34 = vshll.u32 %v799_v63, 16 }
 0x656   :  { %v626_v62 = vpop.xlane.xlu0 %625 }
 0x657   :  { %v627_v3 = vcvt.f32.s32 %v626_v62  ;;  %v569_v4 = vpop.xlane.xlu1 %568 }
 0x658   :  { %v570_v8 = vcvt.f32.s32 %v569_v4 }
 0x659   :  { %v630_v9 = vadd.s32 %v629_v1, %v627_v3 }
 0x65a   :  { %v573_v53 = vadd.s32 %v572_v7, %v570_v8  ;;  %v740_v54 = vpop.xlane.xlu0 %739 }
 0x65b   :  { %v631_v14 = vrot.slane %v630_v9, 4  ;;  %v741_v16 = vcvt.f32.s32 %v740_v54  ;;  %v683_v20 = vpop.xlane.xlu1 %682 }
 0x65c   :  { %v574_v0 = vrot.slane %v573_v53, 4  ;;  %v684_v10 = vcvt.f32.s32 %v683_v20 }
 0x65d   :  { %vm632_vm3 = vcmp.lt.s32.totalorder %v630_v9, %v631_v14  ;;  %v744_v26 = vadd.s32 %v743_v13, %v741_v16 }
 0x65e   :  { %vm575_vm4 = vcmp.lt.s32.totalorder %v573_v53, %v574_v0  ;;  %v687_v28 = vadd.s32 %v686_v21, %v684_v10  ;;  %v854_v29 = vpop.xlane.xlu0 %853  ;;  %v633_v30 = vsel %vm632_vm3, %v630_v9, %v631_v14 }
 0x65f   :  { %v745_v31 = vrot.slane %v744_v26, 4  ;;  %v855_v32 = vcvt.f32.s32 %v854_v29  ;;  %v576_v33 = vsel %vm575_vm4, %v573_v53, %v574_v0  ;;  %v634_v18 = vrot.slane %v633_v30, 2 }
 0x660   :  { %v688_v35 = vrot.slane %v687_v28, 4  ;;  %v797_v24 = vpop.xlane.xlu1 %796  ;;  %v577_v36 = vrot.slane %v576_v33, 2 }
 0x661   :  { %vm746_vm5 = vcmp.lt.s32.totalorder %v744_v26, %v745_v31  ;;  %v858_v25 = vadd.s32 %v857_v27, %v855_v32  ;;  %v798_v37 = vcvt.f32.s32 %v797_v24  ;;  %vm635_vm6 = vcmp.lt.s32.totalorder %v633_v30, %v634_v18 }
 0x662   :  { %vm689_vm7 = vcmp.lt.s32.totalorder %v687_v28, %v688_v35  ;;  %vm578_vm8 = vcmp.lt.s32.totalorder %v576_v33, %v577_v36  ;;  %v636_v38 = vsel %vm635_vm6, %v633_v30, %v634_v18  ;;  %v747_v39 = vsel %vm746_vm5, %v744_v26, %v745_v31 }
 0x663   :  { %v859_v40 = vrot.slane %v858_v25, 4  ;;  %v801_v41 = vadd.s32 %v800_v34, %v798_v37  ;;  %v579_v42 = vsel %vm578_vm8, %v576_v33, %v577_v36  ;;  %v637_v43 = vrot.slane %v636_v38, 1 }
 0x664   :  { %v580_v44 = vrot.slane %v579_v42, 1  ;;  %v690_v45 = vsel %vm689_vm7, %v687_v28, %v688_v35  ;;  %v748_v46 = vrot.slane %v747_v39, 2  ;;  %vm876_vm5 = vcmp.lt.s32.totalorder %v24_v5, 256 }
 0x665   :  { %vm860_vm9 = vcmp.lt.s32.totalorder %v858_v25, %v859_v40  ;;  %v802_v47 = vrot.slane %v801_v41, 4  ;;  %vm638_vm10 = vcmp.lt.s32.totalorder %v636_v38, %v637_v43  ;;  %v691_v48 = vrot.slane %v690_v45, 2 }
 0x666   :  { %vm581_vm11 = vcmp.lt.s32.totalorder %v579_v42, %v580_v44  ;;  %v639_v49 = vsel %vm638_vm10, %v636_v38, %v637_v43  ;;  %vm749_vm12 = vcmp.lt.s32.totalorder %v747_v39, %v748_v46  ;;  %v861_v50 = vsel %vm860_vm9, %v858_v25, %v859_v40 }
 0x667   :  { %vm803_vm13 = vcmp.lt.s32.totalorder %v801_v41, %v802_v47  ;;  %v582_v51 = vsel %vm581_vm11, %v579_v42, %v580_v44  ;;  %vm692_vm14 = vcmp.lt.s32.totalorder %v690_v45, %v691_v48  ;;  %v750_v55 = vsel %vm749_vm12, %v747_v39, %v748_v46 }
 0x668   :  { %968 = vpush %v582_v51  ;;  %v693_v56 = vsel %vm692_vm14, %v690_v45, %v691_v48  ;;  %v751_v57 = vrot.slane %v750_v55, 1  ;;  %v804_v58 = vsel %vm803_vm13, %v801_v41, %v802_v47  ;;  %v862_v60 = vrot.slane %v861_v50, 2 }
 0x669   :  { %970 = vpush %v639_v49  ;;  %v694_v52 = vrot.slane %v693_v56, 1  ;;  %v805_v23 = vrot.slane %v804_v58, 2 }
 0x66a   :  { %vm752_vm15 = vcmp.lt.s32.totalorder %v750_v55, %v751_v57  ;;  %vm863_vm0 = vcmp.lt.s32.totalorder %v861_v50, %v862_v60 }
 0x66b   :  { %vm695_vm1 = vcmp.lt.s32.totalorder %v693_v56, %v694_v52  ;;  %v753_v22 = vsel %vm752_vm15, %v750_v55, %v751_v57  ;;  %vm806_vm2 = vcmp.lt.s32.totalorder %v804_v58, %v805_v23  ;;  %v864_v62 = vsel %vm863_vm0, %v861_v50, %v862_v60 }
 0x66c   :  { %v696_v1 = vsel %vm695_vm1, %v693_v56, %v694_v52  ;;  %v807_v2 = vsel %vm806_vm2, %v804_v58, %v805_v23  ;;  %v865_v3 = vrot.slane %v864_v62, 1 }
 0x66d   :  { %972 = vpush %v696_v1  ;;  %v808_v4 = vrot.slane %v807_v2, 1 }
 0x66e   :  { %974 = vpush %v753_v22  ;;  %vm866_vm3 = vcmp.lt.s32.totalorder %v864_v62, %v865_v3 }
 0x66f   :  { %vm809_vm4 = vcmp.lt.s32.totalorder %v807_v2, %v808_v4  ;;  %v867_v7 = vsel %vm866_vm3, %v864_v62, %v865_v3 }
 0x670   :  { %v810_v6 = vsel %vm809_vm4, %v807_v2, %v808_v4 }
 0x671   :  { %976 = vpush %v810_v6 }
 0x672   :  { %978 = vpush %v867_v7 }
 0x699   :  { %s969_s27 = spop %968 }
 0x69a   :  { %p584_p5 = scmp.lt.s32.totalorder %s969_s27, 1536  ;;  %s971_s28 = spop %970 }
 0x69c   :  { %s1297_s27 = smov (!%p584_p5, %s969_s27), 1536 }
 0x69d   :  { %p641_p6 = scmp.lt.s32.totalorder %s1297_s27, %s971_s28 }
 0x69e   :  { %s973_s1 = spop %972 }
 0x69f   :  { %s1299_s27 = smov (!%p641_p6, %s1297_s27), %s971_s28  ;;  %s975_s29 = spop %974 }
 0x6a0   :  { %p698_p7 = scmp.lt.s32.totalorder %s1299_s27, %s973_s1 }
 0x6a2   :  { %s1301_s27 = smov (!%p698_p7, %s1299_s27), %s973_s1  ;;  %s977_s30 = spop %976 }
 0x6a3   :  { %p755_p8 = scmp.lt.s32.totalorder %s1301_s27, %s975_s29  ;;  %s979_s3 = spop %978 }
 0x6a5   :  { %s1303_s27 = smov (!%p755_p8, %s1301_s27), %s975_s29 }
 0x6a6   :  { %p812_p9 = scmp.lt.s32.totalorder %s1303_s27, %s977_s30 }
 0x6a8   :  { %s1305_s27 = smov (!%p812_p9, %s1303_s27), %s977_s30 }
 0x6a9   :  { %p869_p10 = scmp.lt.s32.totalorder %s1305_s27, %s979_s3 }
 0x6ab   :  { %s1307_s27 = smov (!%p869_p10, %s1305_s27), %s979_s3 }
 0x6ac   :  { %s871_s4 = scvt.s32.f32 %s1307_s27 }
 0x6ae   :  { %v872_v8 = vstv %s871_s4 }
 0x6af   :  { %v873_v9 = vmul.f32 %v872_v8, %v1153_v61  ;;  %v880_v11 = vmul.f32 %v872_v8, %v1175_v15  ;;  %v884_v53 = vmul.f32 %v872_v8, %v1198_v17  ;;  %v888_v54 = vmul.f32 %v872_v8, %v1148_v59 }
 0x6b0   :  { %v892_v13 = vmul.f32 %v872_v8, %v1196_v12  ;;  %v896_v14 = vmul.f32 %v872_v8, %v1200_v19 }
 0x6b1   :  { %878 = vst.msk [vmem:[%s1295_s2] ss:$8 sm:$0x3] %vm876_vm5, %v873_v9  ;;  %927 = vst.msk [vmem:[%s1295_s2 + $0x1] ss:$8 sm:$0x3] %vm876_vm5, %v880_v11 }
 0x6b2   :  { %928 = vst.msk [vmem:[%s1295_s2 + $0x2] ss:$8 sm:$0x3] %vm876_vm5, %v884_v53  ;;  %929 = vst.msk [vmem:[%s1295_s2 + $0x3] ss:$8 sm:$0x3] %vm876_vm5, %v888_v54 }
 0x6b3   :  { %930 = vst.msk [vmem:[%s1295_s2 + $0x4] ss:$8 sm:$0x3] %vm876_vm5, %v892_v13  ;;  %931 = vst.msk [vmem:[%s1295_s2 + $0x5] ss:$8 sm:$0x3] %vm876_vm5, %v896_v14 }
 0x6b4   :  { %904 = vsyncpa [#allocation3], 1 }

</bundles_post_ra>
